<compile_context>
chip_gen: v7x
topology: tpu7x:2x2x1
jax: 0.10.0
libtpu: 0.0.40
codegen_flags: <defaults>
</compile_context>

<pallas_src>
import jax
import jax.numpy as jnp
from jax import lax
from jax.experimental import pallas as pl
from jax.experimental.pallas import tpu as pltpu  # noqa: F401  (TPU backend)

B, S, H, C, VOCAB = 2, 8, 32, 5, 100   # batch, seq, hidden, n_classes, vocab
N_REL = 2                              # RelationExtractor n_relations
T = B * S                              # flattened token count
HA = H + 1                             # hidden + bias (ones) column
PACK_W = 128                           # lane-dense packed output width


def spade_heads_kernel(emb_ref, w_ref, mask_ref, out_ref):
    """Backbone LayerNorm stub + itc head + stc (RelationExtractor) head, one step."""
    x = emb_ref[...]                                            # (T, H)

    # backbone stub: LayerNorm of the embeddings stands in for last_hidden_state.
    # Fused statistics: one pass over the lane axis for sum(x) and sum(x*x).
    s1 = jnp.sum(x, axis=-1, keepdims=True)
    s2 = jnp.sum(x * x, axis=-1, keepdims=True)
    mu = s1 * (1.0 / H)
    var = s2 * (1.0 / H) - mu * mu
    xn = (x - mu) * lax.rsqrt(var + 1e-12)                      # (T, H)

    # augmented activations [xn | 1]: every bias / LN-beta term is folded into w_ref.
    xa = jnp.concatenate([xn, jnp.ones((T, 1), jnp.float32)], axis=-1)  # (T, HA)

    # single fused MXU matmul; cols: [0:HA)=M_0, [HA:2HA)=M_1, [2HA:2HA+C)=itc, rest 0.
    p = jnp.dot(xa, w_ref[...], preferred_element_type=jnp.float32)     # (T, 128)

    # itc head:  Dropout(eval) -> Linear(H, C) -> ReLU
    itc = jnp.maximum(p[:, N_REL * HA:N_REL * HA + C], 0.0)             # (T, C)

    # stc head: score_n[b,i,j] = (xa @ M_n)[b,i] . xa[b,j]   with M_n = Wq_n' Wk_n'^T
    xa3 = xa.reshape(B, S, HA)
    cols = []
    for n in range(N_REL):
        a_n = p[:, n * HA:(n + 1) * HA].reshape(B, S, HA)
        sc = lax.dot_general(a_n, xa3, (((2,), (2,)), ((0,), (0,))),
                             preferred_element_type=jnp.float32)        # (B, S, S)
        cols.append(sc.reshape(T, S))

    # one lane-dense (T, 128) slab: [stc_rel0 | stc_rel1 | itc | zeros]
    packed = jnp.concatenate(
        cols + [itc, jnp.zeros((T, PACK_W - N_REL * S - C), jnp.float32)], axis=-1)

    # loss-time masked_fill (invalid tokens / diagonal) fused into the epilogue;
    # the mask carries 0 on the itc / padding lanes, so only stc scores are replaced.
    out_ref[...] = jnp.where(mask_ref[...] != 0, -10000.0, packed)


def spade_heads(emb_flat, w_fused, mask_slab):
    # grid-less call: whole problem in one step, all operands as full VMEM blocks.
    flops = 2 * T * HA * PACK_W + 2 * N_REL * B * S * S * HA
    bytes_accessed = (emb_flat.size * 4 + w_fused.size * 4 + mask_slab.size
                      + T * PACK_W * 4)
    return pl.pallas_call(
        spade_heads_kernel,
        out_shape=jax.ShapeDtypeStruct((T, PACK_W), jnp.float32),
        cost_estimate=pl.CostEstimate(flops=flops, transcendentals=T,
                                      bytes_accessed=bytes_accessed),
    )(emb_flat, w_fused, mask_slab)


def _get_itc_loss(itc_outputs, batch):
    mask = batch["are_box_first_tokens"].reshape(-1).astype(jnp.float32)
    logits = itc_outputs.reshape(-1, C)
    labels = batch["itc_labels"].reshape(-1)
    logp = jax.nn.log_softmax(logits, axis=-1)
    nll = -jnp.take_along_axis(logp, labels[:, None], axis=1)[:, 0]
    return jnp.sum(nll * mask) / jnp.maximum(jnp.sum(mask), 1.0)


def _get_stc_loss(stc_outputs, batch):
    # stc_outputs is already masked in the kernel epilogue (reference masks in place).
    # reference: view(-1, S)[torch.where(attention_mask.view(-1))] only indexes the
    # first B*S rows, i.e. relation 0.
    logits = stc_outputs.reshape(-1, S)[: B * S]
    mask = batch["attention_mask"].reshape(-1).astype(jnp.float32)
    labels = batch["stc_labels"].reshape(-1)
    # TODO(synk): the reference broadcasts integer labels to the logits shape before
    # CrossEntropyLoss (invalid for index targets in torch); implemented here as the
    # intended per-row index-target cross entropy.
    logp = jax.nn.log_softmax(logits, axis=-1)
    nll = -jnp.take_along_axis(logp, labels[:, None], axis=1)[:, 0]
    return jnp.sum(nll * mask) / jnp.maximum(jnp.sum(mask), 1.0)


def layoutlm_spade_forward(params, batch):
    input_ids = batch["input_ids"]
    attention_mask = batch["attention_mask"]

    # TODO(synk): the pretrained LayoutLM/BERT transformer backbone cannot be
    # reproduced in-script; replaced by a deterministic word+position embedding
    # followed by an in-kernel LayerNorm as the last_hidden_state stub.
    pos = jnp.arange(S)
    emb = (params["word_emb"][input_ids]
           + params["pos_emb"][pos][None, :, :]).astype(jnp.float32)
    emb_flat = emb.reshape(T, H)

    gamma, beta = params["ln_gamma"], params["ln_beta"]

    def fold(w, b):
        # Fold LayerNorm affine + bias into an augmented (H+1, out) weight so that
        #   (xn*gamma + beta) @ w + b  ==  [xn | 1] @ fold(w, b)
        return jnp.concatenate([gamma[:, None] * w, (beta @ w + b)[None, :]], axis=0)

    wq_aug = fold(params["w_q"], params["b_q"])          # (H+1, N_REL*H)
    wk_aug = fold(params["w_k"], params["b_k"])          # (H+1, N_REL*H)
    witc_aug = fold(params["w_itc"], params["b_itc"])    # (H+1, C)

    # Per-relation M_n = Wq_n' @ Wk_n'^T: relation scores become (xa @ M_n) @ xa^T,
    # removing the q/k projections from the kernel entirely.
    m_blocks = [wq_aug[:, n * H:(n + 1) * H] @ wk_aug[:, n * H:(n + 1) * H].T
                for n in range(N_REL)]                   # each (H+1, H+1)
    w_fused = jnp.concatenate(m_blocks + [witc_aug], axis=-1)             # (H+1, 71)
    w_fused = jnp.pad(w_fused, ((0, 0), (0, PACK_W - w_fused.shape[1])))  # (H+1, 128)

    # masked_fill pattern on the packed (T, 128) slab: stc col c = n*S + j is masked
    # where attention_mask[b, j] == 0 or i == j (same as the reference); the itc and
    # padding lanes are never masked.
    attn_bool = attention_mask.astype(bool)                               # (B, S)
    col_invalid = jnp.repeat(~attn_bool, S, axis=0)                       # (T, S)
    diag = jnp.tile(jnp.eye(S, dtype=bool), (B, 1))                       # (T, S)
    stc_mask = jnp.tile(col_invalid | diag, (1, N_REL))                   # (T, N_REL*S)
    mask_slab = jnp.pad(stc_mask,
                        ((0, 0), (0, PACK_W - N_REL * S))).astype(jnp.int8)  # (T, 128)

    packed = spade_heads(emb_flat, w_fused, mask_slab)                    # (T, 128)

    itc_outputs = packed[:, N_REL * S:N_REL * S + C].reshape(B, S, C)
    # stc lanes: (T, N_REL*S) -> (N_REL, B, S, S); already masked in the kernel
    stc_outputs = packed[:, :N_REL * S].reshape(B, S, N_REL, S).transpose(2, 0, 1, 3)

    itc_loss = _get_itc_loss(itc_outputs, batch)
    stc_loss = _get_stc_loss(stc_outputs, batch)
    return {
        "itc_outputs": itc_outputs,
        "stc_outputs": stc_outputs,
        "attention_mask": attention_mask,
        "loss": itc_loss + stc_loss,
    }


if __name__ == "__main__":
    key = jax.random.PRNGKey(0)
    ks = jax.random.split(key, 8)
    params = {
        "word_emb": 0.02 * jax.random.normal(ks[0], (VOCAB, H), jnp.float32),
        "pos_emb": 0.02 * jax.random.normal(ks[1], (S, H), jnp.float32),
        "ln_gamma": jnp.ones((H,), jnp.float32),
        "ln_beta": jnp.zeros((H,), jnp.float32),
        "w_itc": 0.02 * jax.random.normal(ks[2], (H, C), jnp.float32),
        "b_itc": jnp.zeros((C,), jnp.float32),
        "w_q": 0.02 * jax.random.normal(ks[3], (H, N_REL * H), jnp.float32),
        "b_q": jnp.zeros((N_REL * H,), jnp.float32),
        "w_k": 0.02 * jax.random.normal(ks[4], (H, N_REL * H), jnp.float32),
        "b_k": jnp.zeros((N_REL * H,), jnp.float32),
    }
    batch = {
        "input_ids": jax.random.randint(ks[5], (B, S), 0, VOCAB),
        "attention_mask": jnp.array([[1, 1, 1, 1, 1, 1, 0, 0],
                                     [1, 1, 1, 1, 1, 0, 0, 0]], jnp.int32),
        "are_box_first_tokens": jnp.array([[1, 0, 1, 0, 1, 0, 0, 0],
                                           [1, 1, 0, 0, 1, 0, 0, 0]], jnp.int32),
        "itc_labels": jax.random.randint(ks[6], (B, S), 0, C),
        "stc_labels": jax.random.randint(ks[7], (B, S), 0, S),
    }

    out = layoutlm_spade_forward(params, batch)
    jax.block_until_ready(out["loss"])
    assert out["itc_outputs"].shape == (B, S, C)
    assert out["stc_outputs"].shape == (N_REL, B, S, S)
    assert out["loss"].shape == ()
    print("KERNEL_OK")
</pallas_src>

<mosaic_0001>
module attributes {stable_mosaic.version = 11 : i64} {
  func.func @spade_heads_kernel(%arg0: memref<16x32xf32, #tpu.memory_space<vmem>>, %arg1: memref<33x128xf32, #tpu.memory_space<vmem>>, %arg2: memref<16x128xi8, #tpu.memory_space<vmem>>, %arg3: memref<16x128xf32, #tpu.memory_space<vmem>>) attributes {dimension_semantics = [], scalar_prefetch = 0 : i64, scratch_operands = 0 : i64, tpu.core_type = #tpu.core_type<tc>} {
    %c0 = arith.constant 0 : index
    %c0_0 = arith.constant 0 : index
    %0 = vector.load %arg0[%c0, %c0_0] : memref<16x32xf32, #tpu.memory_space<vmem>>, vector<16x32xf32>
    %cst = arith.constant dense<0.000000e+00> : vector<16xf32>
    %1 = vector.multi_reduction <add>, %0, %cst [1] : vector<16x32xf32> to vector<16xf32>
    %2 = vector.shape_cast %1 : vector<16xf32> to vector<16x1xf32>
    %3 = arith.mulf %0, %0 : vector<16x32xf32>
    %cst_1 = arith.constant dense<0.000000e+00> : vector<16xf32>
    %4 = vector.multi_reduction <add>, %3, %cst_1 [1] : vector<16x32xf32> to vector<16xf32>
    %5 = vector.shape_cast %4 : vector<16xf32> to vector<16x1xf32>
    %cst_2 = arith.constant 3.125000e-02 : f32
    %6 = vector.broadcast %cst_2 : f32 to vector<16x1xf32>
    %7 = arith.mulf %2, %6 : vector<16x1xf32>
    %cst_3 = arith.constant 3.125000e-02 : f32
    %8 = vector.broadcast %cst_3 : f32 to vector<16x1xf32>
    %9 = arith.mulf %5, %8 : vector<16x1xf32>
    %10 = arith.mulf %7, %7 : vector<16x1xf32>
    %11 = arith.subf %9, %10 : vector<16x1xf32>
    %12 = vector.broadcast %7 : vector<16x1xf32> to vector<16x32xf32>
    %13 = arith.subf %0, %12 : vector<16x32xf32>
    %cst_4 = arith.constant 9.99999996E-13 : f32
    %14 = vector.broadcast %cst_4 : f32 to vector<16x1xf32>
    %15 = arith.addf %11, %14 : vector<16x1xf32>
    %16 = math.rsqrt %15 : vector<16x1xf32>
    %17 = vector.broadcast %16 : vector<16x1xf32> to vector<16x32xf32>
    %18 = arith.mulf %13, %17 : vector<16x32xf32>
    %cst_5 = arith.constant 1.000000e+00 : f32
    %19 = vector.broadcast %cst_5 : f32 to vector<16x1xf32>
    %20 = tpu.concatenate %18, %19 in 1 : vector<16x32xf32>, vector<16x1xf32> -> vector<16x33xf32>
    %c0_6 = arith.constant 0 : index
    %c0_7 = arith.constant 0 : index
    %21 = vector.load %arg1[%c0_6, %c0_7] : memref<33x128xf32, #tpu.memory_space<vmem>>, vector<33x128xf32>
    %cst_8 = arith.constant dense<0.000000e+00> : vector<16x128xf32>
    %22 = tpu.matmul %20, %21, %cst_8 {dimension_numbers = #tpu.dot_dimension_numbers<[1], [0], [0], [1], [0, 0, 1, 1], [], []>} : vector<16x33xf32>, vector<33x128xf32>, vector<16x128xf32> -> vector<16x128xf32>
    %23 = vector.extract_strided_slice %22 {offsets = [0, 66], sizes = [16, 5], strides = [1, 1]} : vector<16x128xf32> to vector<16x5xf32>
    %cst_9 = arith.constant 0.000000e+00 : f32
    %24 = vector.broadcast %cst_9 : f32 to vector<16x5xf32>
    %25 = arith.maximumf %23, %24 : vector<16x5xf32>
    %26 = vector.shape_cast %20 : vector<16x33xf32> to vector<2x8x33xf32>
    %27 = vector.extract_strided_slice %22 {offsets = [0, 0], sizes = [16, 33], strides = [1, 1]} : vector<16x128xf32> to vector<16x33xf32>
    %28 = vector.shape_cast %27 : vector<16x33xf32> to vector<2x8x33xf32>
    %cst_10 = arith.constant dense<0.000000e+00> : vector<2x8x8xf32>
    %29 = tpu.matmul %28, %26, %cst_10 {dimension_numbers = #tpu.dot_dimension_numbers<[2], [2], [1], [1], [0, 0, 0, 1, 1, 1], [0], [0]>} : vector<2x8x33xf32>, vector<2x8x33xf32>, vector<2x8x8xf32> -> vector<2x8x8xf32>
    %30 = vector.shape_cast %29 : vector<2x8x8xf32> to vector<16x8xf32>
    %31 = vector.extract_strided_slice %22 {offsets = [0, 33], sizes = [16, 33], strides = [1, 1]} : vector<16x128xf32> to vector<16x33xf32>
    %32 = vector.shape_cast %31 : vector<16x33xf32> to vector<2x8x33xf32>
    %cst_11 = arith.constant dense<0.000000e+00> : vector<2x8x8xf32>
    %33 = tpu.matmul %32, %26, %cst_11 {dimension_numbers = #tpu.dot_dimension_numbers<[2], [2], [1], [1], [0, 0, 0, 1, 1, 1], [0], [0]>} : vector<2x8x33xf32>, vector<2x8x33xf32>, vector<2x8x8xf32> -> vector<2x8x8xf32>
    %34 = vector.shape_cast %33 : vector<2x8x8xf32> to vector<16x8xf32>
    %cst_12 = arith.constant 0.000000e+00 : f32
    %35 = vector.broadcast %cst_12 : f32 to vector<16x107xf32>
    %36 = tpu.concatenate %30, %34, %25, %35 in 1 : vector<16x8xf32>, vector<16x8xf32>, vector<16x5xf32>, vector<16x107xf32> -> vector<16x128xf32>
    %c0_13 = arith.constant 0 : index
    %c0_14 = arith.constant 0 : index
    %37 = vector.load %arg2[%c0_13, %c0_14] : memref<16x128xi8, #tpu.memory_space<vmem>>, vector<16x128xi8>
    %c0_i8 = arith.constant 0 : i8
    %38 = vector.broadcast %c0_i8 : i8 to vector<16x128xi8>
    %39 = arith.cmpi ne, %37, %38 : vector<16x128xi8>
    %cst_15 = arith.constant -1.000000e+04 : f32
    %40 = vector.broadcast %cst_15 : f32 to vector<16x128xf32>
    %41 = arith.select %39, %40, %36 : vector<16x128xi1>, vector<16x128xf32>
    %c0_16 = arith.constant 0 : index
    %c0_17 = arith.constant 0 : index
    %42 = vector.load %arg3[%c0_16, %c0_17] : memref<16x128xf32, #tpu.memory_space<vmem>>, vector<16x128xf32>
    tpu.vector_store %arg3[%c0_16, %c0_17], %41 {strides = array<i32>} : memref<16x128xf32, #tpu.memory_space<vmem>>, vector<16x128xf32>,
    return
  }
}

</mosaic_0001>

<bundles_post_ra>
// kernel: tpu_custom_call.1
= control target key start
LH: loop header
LB: loop body
LE: loop exit
PB: predicated region body
PF: predicated region fallthrough
CT: control target
= control target key end

     0   :  { %8 = vsyncpa [#allocation3], 0  ;;  %s782_s0 = inlined_call_operand.hbm [shape: f32[16,32], index: 0, kind: input, shape index: {}]   ;;  %s783_s1 = inlined_call_operand.hbm [shape: f32[33,128], index: 1, kind: input, shape index: {}]   ;;  %s784_s2 = inlined_call_operand.vmem [shape: s8[16,128], index: 2, kind: input, shape index: {}]   ;;  %s785_s3 = inlined_call_operand.hbm [shape: f32[16,128], index: 3, kind: output, shape index: {}]  }
   0x1   :  { %9 = vsyncpa [#allocation6], 0 }
   0x2   :  { %10 = vsyncpa [#allocation4], 0  ;;  %s677_s12 = smov [#allocation2]   ;;  %s605_s16 = scalar_lea.hbm %s782_s0, 256 }
   0x3   :  { %s16_s13 = sshll.u32 %s677_s12, 4  ;;  %p606_p0 = scmp.ne.s32.totalorder %s782_s0, %s605_s16  ;;  %s17_s13 = int_to_ptr.vmem [resolvable:$true] %s16_s13 }
   0x4   :  { %p609_p1 = scmp.lt.u32.totalorder %s605_s16, %s782_s0 }
   0x6   :  { %p611_p2 = pnand %p609_p1, %p606_p0 }
   0x8   :  { %614 = shalt.err (!%p611_p2)
}
   0x9   :  { %s615_s21 = scalar_lea.vmem %s17_s13, 256  ;;  %p620_p4 = scmp.lt.s32.totalorder %s17_s13, %s17_s13 }
   0xa   :  { %p616_p3 = scmp.ne.s32.totalorder %s17_s13, %s615_s21  ;;  %p621_p5 = scmp.lt.s32.totalorder %s615_s21, %s615_s21 }
   0xc   :  { %p622_p6 = por %p621_p5, %p620_p4 }
   0xe   :  { %p623_p7 = pnand %p622_p6, %p616_p3 }
  0x10   :  { %626 = shalt.err (!%p623_p7)
}
  0x11   :  { %s678_s22 = smov 128   ;;  %s679_s23 = smov 8  }
  0x12   :  { %22 = dma.hbm_to_vmem [thread:$0]  %s782_s0, 256, %s17_s13, [#allocation3], %s678_s22, %s678_s22, %s679_s23  }
  0x13   :  { %s680_s26 = smov [#allocation5]   ;;  %s627_s30 = scalar_lea.hbm %s783_s1, 640 }
  0x14   :  { %s28_s27 = sshll.u32 %s680_s26, 4  ;;  %p628_p8 = scmp.ne.s32.totalorder %s783_s1, %s627_s30  ;;  %s29_s27 = int_to_ptr.vmem [resolvable:$true] %s28_s27 }
  0x15   :  { %p631_p9 = scmp.lt.u32.totalorder %s627_s30, %s783_s1 }
  0x17   :  { %p633_p10 = pnand %p631_p9, %p628_p8 }
  0x19   :  { %636 = shalt.err (!%p633_p10)
}
  0x1a   :  { %s637_s8 = scalar_lea.vmem %s29_s27, 640  ;;  %p642_p12 = scmp.lt.s32.totalorder %s29_s27, %s29_s27 }
  0x1b   :  { %p638_p11 = scmp.ne.s32.totalorder %s29_s27, %s637_s8  ;;  %p643_p13 = scmp.lt.s32.totalorder %s637_s8, %s637_s8 }
  0x1d   :  { %p644_p0 = por %p643_p13, %p642_p12 }
  0x1f   :  { %p645_p1 = pnand %p644_p0, %p638_p11 }
  0x21   :  { %648 = shalt.err (!%p645_p1)
}
  0x22   :  { %34 = dma.hbm_to_vmem [thread:$0]  %s783_s1, 640, %s29_s27, [#allocation6], %s678_s22, %s678_s22, %s679_s23  }
  0x23   :  { %671 = dma.done.wait [#allocation3], 256  }
  0x24   :  { %672 = vsyncadd [#allocation3], 4294967040 }
  0x25   :  { %673 = dma.done.wait [#allocation6], 640  }
  0x26   :  { %674 = vsyncadd [#allocation6], 4294966656  ;;  %vm47_vm0 = vcmask 261120   ;;  %v45_v0 = vld [vmem:[#allocation2] sm:$0xff]  ;;  %v46_v1 = vld [vmem:[#allocation2 + $0x8] sm:$0xff]  ;;  %vm92_vm1 = vcmask 1040384  }
  0x27   :  { %v48_v2 = vsel %vm47_vm0, %v45_v0, 0.0  ;;  %v54_v3 = vmul.f32 %v45_v0, %v45_v0  ;;  %v55_v4 = vmul.f32 %v46_v1, %v46_v1  ;;  %v51_v6 = vsel %vm47_vm0, %v46_v1, 0.0  ;;  %v80_v8 = vld [vmem:[#allocation5] sm:$0xff]  ;;  %v81_v9 = vld [vmem:[#allocation5 + $0x8] sm:$0xff]  ;;  %v82_v11 = vld [vmem:[#allocation5 + $0x10] sm:$0xff]  ;;  %s683_s1 = smov 95  }
  0x28   :  { %49 = vadd.xlane.f32.xlu0 %v48_v2  ;;  %v583_v10 = vpack.c.bf16 %v81_v9, %v80_v8  ;;  %v83_v12 = vld [vmem:[#allocation5 + $0x18] sm:$0xff]  ;;  %v84_v14 = vld [vmem:[#allocation5 + $0x20] sm:$0x1]  ;;  %v681_v15 = vmov 0.0   ;;  %vm85_vm2 = vcmask 269312   ;;  %vm682_vm3 = vmmov 0  }
  0x29   :  { %v56_v5 = vsel %vm47_vm0, %v54_v3, 0.0  ;;  %v59_v7 = vsel %vm47_vm0, %v55_v4, 0.0  ;;  %v587_v13 = vpack.c.bf16 %v83_v12, %v82_v11  ;;  %563 = vmatprep.subr.mxu1 %v681_v15  ;;  %565 = vmatprep.mubr.msk.f32.mxu1 %vm682_vm3, %v681_v15  ;;  %s684_s10 = smov 78   ;;  %v492_v52 = vld [vmem:[%s784_s2] sm:$0x3]  ;;  %v685_v54 = vmov 0  }
  0x2a   :  { %57 = vadd.xlane.f32.xlu1 %v56_v5  ;;  %584 = vmatprep.subr.bf16.mxu0 %v583_v10  ;;  %v493_v53 = vld [vmem:[%s784_s2 + $0x2] sm:$0x3]  ;;  %vm494_vm4 = vnez %v492_v52  ;;  %vm486_vm6 = vcmask 130048   ;;  %vm483_vm7 = vcmask 64512   ;;  %vm489_vm8 = vcmask 171008   ;;  %s686_s15 = smov [#allocation7]  }
  0x2b   :  { %586 = vmatpush3.bf16.msra.mxu0 %v583_v10  ;;  %vm495_vm5 = vnez %v493_v53  ;;  %v496_v55 = vsel %vm494_vm4, 16843009, %v685_v54  ;;  %s511_s2 = sshll.u32 %s686_s15, 4  ;;  %s512_s2 = int_to_ptr.vmem [resolvable:$true] %s511_s2 }
  0x2c   :  { %52 = vadd.xlane.f32.xlu0 %v51_v6  ;;  %588 = vmatprep.subr.bf16.mxu0 %v587_v13  ;;  %v497_v57 = vsel %vm495_vm5, 16843009, %v685_v54  ;;  %v498_v58 = vunpack.c.0.s8 %v496_v55  ;;  %s649_s16 = scalar_lea.vmem %s512_s2, 256  ;;  %p654_p3 = scmp.lt.s32.totalorder %s512_s2, %s512_s2 }
  0x2d   :  { %v499_v60 = vunpack.c.0.s8 %v497_v57  ;;  %p650_p2 = scmp.ne.s32.totalorder %s512_s2, %s649_s16  ;;  %p655_p4 = scmp.lt.s32.totalorder %s649_s16, %s649_s16 }
  0x2e   :  { %60 = vadd.xlane.f32.xlu1 %v59_v7  ;;  %vm500_vm9 = vcmp.ne.s32.totalorder %v498_v58, 0 }
  0x2f   :  { %590 = vmatpush3.bf16.msra.mxu0 %v587_v13  ;;  %vm501_vm10 = vcmp.ne.s32.totalorder %v499_v60, 0  ;;  %p656_p5 = por %p655_p4, %p654_p3 }
  0x30   :  { %558 = vmatprep.subr.msk.mxu0 %vm92_vm1, %v84_v14 }
  0x31   :  { %p657_p6 = pnand %p656_p5, %p650_p2 }
  0x33   :  { %559 = vmatpush3.msk.msra.mxu0 %vm92_vm1, %v84_v14 }
  0x34   :  { %578 = vmatprep.subr.mxu0 %v681_v15 }
  0xb5   :  { %v50_v16 = vpop.xlane.xlu0 %49 }
  0xb6   :  { %v62_v17 = vmul.f32 0.03125, %v50_v16 }
  0xb7   :  { %v58_v18 = vpop.xlane.xlu1 %57 }
  0xb8   :  { %v66_v19 = vmul.f32 %v62_v17, %v62_v17  ;;  %v64_v20 = vmul.f32 0.03125, %v58_v18  ;;  %v70_v30 = vsub.f32 %v45_v0, %v62_v17 }
  0xb9   :  { %v53_v21 = vpop.xlane.xlu0 %52 }
  0xba   :  { %v68_v22 = vsub.f32 %v64_v20, %v66_v19  ;;  %v63_v23 = vmul.f32 0.03125, %v53_v21 }
  0xbb   :  { %v61_v24 = vpop.xlane.xlu1 %60 }
  0xbc   :  { %v72_v25 = vadd.f32 1e-12, %v68_v22  ;;  %v67_v26 = vmul.f32 %v63_v23, %v63_v23  ;;  %v65_v27 = vmul.f32 0.03125, %v61_v24  ;;  %v71_v33 = vsub.f32 %v46_v1, %v63_v23 }
  0xbe   :  { %601 = vrsqrt.f32 %v72_v25  ;;  %v69_v28 = vsub.f32 %v65_v27, %v67_v26 }
  0xc0   :  { %v73_v29 = vadd.f32 1e-12, %v69_v28 }
  0xc2   :  { %603 = vrsqrt.f32 %v73_v29 }
  0xc8   :  { %v602_v31 = vpop.eup %601 }
  0xc9   :  { %v76_v32 = vmul.f32 %v602_v31, %v70_v30 }
  0xcb   :  { %v78_v34 = vsel %vm47_vm0, %v76_v32, 1.0 }
  0xcc   :  { %v604_v35 = vpop.eup %603  ;;  %560 = vmatprep.mubr.msk.f32.mxu0 %vm85_vm2, %v78_v34  ;;  %564 = vmatpush3.xpose.msk.msra.mxu1 %vm85_vm2, %v78_v34 }
  0xcd   :  { %v77_v36 = vmul.f32 %v604_v35, %v71_v33  ;;  %568 = vmatprep.subr.mxu1 %v681_v15 }
  0xcf   :  { %v79_v37 = vsel %vm47_vm0, %v77_v36, 1.0 }
  0xd0   :  { %561 = vmatmul.mubr.msk.f32.vlgmr.msra.gmra.mrb[0].mxu0 %vm85_vm2, %v79_v37 }
  0xd1   :  { %579 = vmatpush3.xpose.msk.msra.mxu0 %vm85_vm2, %v79_v37  ;;  %580 = vmatprep.mubr.msk.f32.mxu0 %vm682_vm3, %v681_v15 }
 0x1a3   :  { %v562_v38 = vpop.f32.mrb[0].mxu0 }
 0x1a4   :  { %393 = vrot.lane.b32.xlu1 %v562_v38, %s683_s1  ;;  %v162_v39 = vpop.f32.mrb[1].mxu0  ;;  %v172_v51 = vmax.f32 %v562_v38, 0.0 }
 0x1a5   :  { %319 = vrot.lane.b32.xlu0 %v162_v39, %s683_s1  ;;  %566 = vmatmul.mubr.msk.f32.vlgmr.msra.gmra.mrb[0].mxu1 %vm85_vm2, %v162_v39  ;;  %v171_v40 = vmax.f32 %v162_v39, 0.0 }
 0x1a6   :  { %569 = vmatpush3.xpose.msk.msra.mxu1 %vm85_vm2, %v79_v37  ;;  %570 = vmatprep.mubr.msk.f32.mxu1 %vm682_vm3, %v681_v15 }
 0x1a7   :  { %573 = vmatprep.subr.mxu1 %v681_v15 }
 0x1a9   :  { %571 = vmatmul.mubr.msk.f32.vlgmr.msra.gmra.mrb[2].mxu1 %vm85_vm2, %v562_v38  ;;  %477 = vrot.lane.b32.xlu0 %v171_v40, %s684_s10 }
 0x1aa   :  { %574 = vmatpush3.xpose.msk.msra.mxu1 %vm85_vm2, %v78_v34  ;;  %575 = vmatprep.mubr.msk.f32.mxu1 %vm682_vm3, %v681_v15 }
 0x216   :  { %v394_v41 = vpop.permute.xlu1 %393 }
 0x217   :  { %581 = vmatmul.mubr.msk.f32.vlgmr.msra.gmra.mrb[2].mxu0 %vm85_vm2, %v394_v41  ;;  %v320_v42 = vpop.permute.xlu0 %319 }
 0x218   :  { %576 = vmatmul.mubr.msk.f32.vlgmr.msra.gmra.mrb[4].mxu1 %vm85_vm2, %v320_v42 }
 0x21b   :  { %v478_v61 = vpop.permute.xlu0 %477 }
 0x278   :  { %v242_v43 = vpop.f32.mrb[0].mxu1 }
 0x279   :  { %v567_v44 = vpop.f32.mrb[1].mxu1 }
 0x27c   :  { %v315_v45 = vpop.f32.mrb[2].mxu1 }
 0x27d   :  { %v572_v46 = vpop.f32.mrb[3].mxu1 }
 0x2ea   :  { %v463_v47 = vpop.f32.mrb[2].mxu0 }
 0x2eb   :  { %471 = vrot.lane.b32.xlu1 %v463_v47, %s679_s23  ;;  %v389_v48 = vpop.f32.mrb[4].mxu1  ;;  %v582_v49 = vpop.f32.mrb[3].mxu0 }
 0x2ec   :  { %v577_v50 = vpop.f32.mrb[5].mxu1 }
 0x2ef   :  { %469 = vrot.lane.b32.xlu1 %v389_v48, %s679_s23 }
 0x2f3   :  { %479 = vrot.lane.b32.xlu1 %v172_v51, %s684_s10 }
 0x35d   :  { %v472_v56 = vpop.permute.xlu1 %471 }
 0x35e   :  { %v485_v1 = vsel %vm483_vm7, %v315_v45, %v472_v56 }
 0x361   :  { %v470_v59 = vpop.permute.xlu1 %469 }
 0x362   :  { %v484_v62 = vsel %vm483_vm7, %v242_v43, %v470_v59 }
 0x363   :  { %v487_v63 = vsel %vm486_vm6, %v484_v62, %v478_v61 }
 0x364   :  { %v490_v0 = vsel %vm489_vm8, %v487_v63, 0.0 }
 0x365   :  { %v480_v2 = vpop.permute.xlu1 %479  ;;  %v502_v3 = vsel %vm500_vm9, -10000.0, %v490_v0 }
 0x366   :  { %v488_v4 = vsel %vm486_vm6, %v485_v1, %v480_v2  ;;  %504 = vst [vmem:[#allocation7] sm:$0xff] %v502_v3 }
 0x367   :  { %v491_v5 = vsel %vm489_vm8, %v488_v4, 0.0 }
 0x368   :  { %v503_v6 = vsel %vm501_vm10, -10000.0, %v491_v5 }
 0x369   :  { %505 = vst [vmem:[#allocation7 + $0x8] sm:$0xff] %v503_v6 }
 0x36a   :  { %660 = shalt.err (!%p657_p6)
}
 0x36b   :  { %s661_s19 = scalar_lea.hbm %s785_s3, 256 }
 0x36c   :  { %p662_p7 = scmp.ne.s32.totalorder %s785_s3, %s661_s19  ;;  %p665_p8 = scmp.lt.u32.totalorder %s661_s19, %s785_s3 }
 0x36e   :  { %p667_p9 = pnand %p665_p8, %p662_p7 }
 0x370   :  { %670 = shalt.err (!%p667_p9)
}
 0x371   :  { %517 = dma.vmem_to_hbm [thread:$0]  %s512_s2, 256, %s785_s3, [#allocation4], %s678_s22, %s678_s22, %s679_s23  }
 0x372   :  { %675 = dma.done.wait [#allocation4], 256  }
 0x373   :  { %676 = vsyncadd [#allocation4], 4294967040 }
 0x374   :  { %521 = vsyncpa [#allocation3], 1 }
 0x375   :  { %522 = vsyncpa [#allocation6], 1 }
 0x376   :  { %523 = vsyncpa [#allocation4], 1 }

</bundles_post_ra>
